<compile_context>
chip_gen: v5e
topology: v5e:2x2
jax: 0.10.0
libtpu: 0.0.40
codegen_flags: <defaults>
</compile_context>

<pallas_src>
import functools

import jax
import jax.numpy as jnp
import numpy as np
from jax.experimental import pallas as pl
from jax.experimental.pallas import tpu as pltpu


def _round_up(a, b):
    return (a + b - 1) // b * b


def _cdiv(a, b):
    return (a + b - 1) // b


# ---------------------------------------------------------------------------
# Kernel 1: label cleanup + y^T y on the MXU + clamp -> (N_pad, N_pad) table.
#   grid = (n_i, n_j, n_b); output tile (TI, TJ) accumulated over the batch
#   axis.  Tiles entirely on/below the diagonal skip the MXU work (their
#   entries are never consumed downstream).
# ---------------------------------------------------------------------------
def _pair_target_kernel(yl_ref, yr_ref, t_ref, acc_ref, *, ti, tj):
    i = pl.program_id(0)
    j = pl.program_id(1)
    b = pl.program_id(2)
    nb = pl.num_programs(2)

    @pl.when(b == 0)
    def _():
        acc_ref[...] = jnp.zeros_like(acc_ref)

    # Strict-upper entries need col > row; skip tiles that contain none.
    has_upper = (j * tj + (tj - 1)) > (i * ti)

    @pl.when(has_upper)
    def _():
        yl = yl_ref[...]
        yr = yr_ref[...]
        yl = jnp.where(yl == -1.0, 0.0, yl)              # y[y == -1] = 0
        yr = jnp.where(yr == -1.0, 0.0, yr)
        acc_ref[...] += jax.lax.dot_general(             # y^T @ y (contract batch)
            yl, yr,
            dimension_numbers=(((0,), (0,)), ((), ())),
            preferred_element_type=jnp.float32)

    @pl.when(b == nb - 1)
    def _():
        t_ref[...] = jnp.minimum(acc_ref[...], 1.0)      # t[t > 1] = 1


# ---------------------------------------------------------------------------
# Kernel 2: running max over K + BCE-with-logits + lane-dense partial sums.
#   grid = (n_p [parallel], n_k [arbitrary, reduction over K blocks])
#   x_ref   : (Kb, TR, 128) logits, native dtype (upcast in-kernel)
#   t_ref   : (TR, 128) f32 pair targets in {0,1}; -1 marks padding lanes
#   o_ref   : (1, 8, 128) f32 partial sums for this P tile
#   xmax_ref: (TR, 128) f32 running-max scratch (persists across the K axis)
# ---------------------------------------------------------------------------
def _bce_pool_kernel(x_ref, t_ref, o_ref, xmax_ref):
    k = pl.program_id(1)
    nk = pl.num_programs(1)

    x = x_ref[...].astype(jnp.float32)       # bf16 DMA, f32 math (v5e-safe)
    blk_max = jnp.max(x, axis=0)             # leading-axis max -> pure VALU

    @pl.when(k == 0)
    def _():
        xmax_ref[...] = blk_max

    @pl.when(k > 0)
    def _():
        xmax_ref[...] = jnp.maximum(xmax_ref[...], blk_max)

    @pl.when(k == nk - 1)
    def _():
        xp = xmax_ref[...]
        t = t_ref[...]
        valid = t >= 0.0
        tt = jnp.where(valid, t, 0.0)
        # Stable BCE-with-logits: max(x, 0) - x*t + log(1 + exp(-|x|))
        bce = (jnp.maximum(xp, 0.0) - xp * tt
               + jnp.log(1.0 + jnp.exp(-jnp.abs(xp))))
        bce = jnp.where(valid, bce, 0.0)
        tr = bce.shape[0]
        # (TR,128) -> (TR//8, 8, 128) is layout-preserving; sum over the
        # leading axis is pure VALU adds and the store is a full (8,128) vreg.
        o_ref[...] = jnp.sum(bce.reshape(tr // 8, 8, 128), axis=0)[None]


def _vmem_capacity_bytes():
    try:
        info = pltpu.get_tpu_info()
        return int(getattr(info, "vmem_capacity_bytes", 64 * 1024 * 1024))
    except Exception:
        return 64 * 1024 * 1024              # conservative (v7x per-TC VMEM)


# ---------------------------------------------------------------------------
# Wrapper
# ---------------------------------------------------------------------------
@jax.jit
def multilabel_pair_loss(x, y):
    """Forward of MultilabelPairLoss(enable_maxpool=True).

    x: (K, P) float logits for class pairs, P = N*(N-1)/2, columns in
       row-major strict-upper-triangular pair order.
    y: (B, N) multilabel targets in {-1, 0, 1}.
    """
    K, P = x.shape
    B, N = y.shape
    assert N >= 2 and P == N * (N - 1) // 2, \
        "x columns must enumerate N*(N-1)/2 pairs"

    # =======================================================================
    # Stage 1: pair-target table T = clamp(y^T y, 1), tiled on the MXU.
    # =======================================================================
    TI = TJ = min(256, _round_up(N, 128))
    TB = min(512, _round_up(B, 8))
    N_pad = _round_up(N, TI)
    B_pad = _round_up(B, TB)
    n_i, n_j, n_b = N_pad // TI, N_pad // TJ, B_pad // TB

    y_pad = jnp.pad(y.astype(jnp.float32), ((0, B_pad - B), (0, N_pad - N)))

    t_mat = pl.pallas_call(
        functools.partial(_pair_target_kernel, ti=TI, tj=TJ),
        out_shape=jax.ShapeDtypeStruct((N_pad, N_pad), jnp.float32),
        grid=(n_i, n_j, n_b),
        in_specs=[
            pl.BlockSpec((TB, TI), lambda i, j, b: (b, i)),
            pl.BlockSpec((TB, TJ), lambda i, j, b: (b, j)),
        ],
        out_specs=pl.BlockSpec((TI, TJ), lambda i, j, b: (i, j)),
        scratch_shapes=[pltpu.VMEM((TI, TJ), jnp.float32)],
        compiler_params=pltpu.CompilerParams(
            dimension_semantics=("parallel", "parallel", "arbitrary")),
    )(y_pad, y_pad)

    # -----------------------------------------------------------------------
    # Pack strict-upper entries in row-major triu order with N-1 contiguous
    # row copies (no P-element scalar gather).  Row i contributes T[i, i+1:N]
    # at packed offset off(i) = i*N - i*(i+1)/2.  Writing the full N-wide row
    # at (N + off(i) - (i+1)) in *descending* i order lets later (smaller-i)
    # rows overwrite the (i+1) junk leading entries of earlier rows.
    # -----------------------------------------------------------------------
    L = N + P

    def _pack_row(s, buf):
        i = (N - 2) - s
        row = jax.lax.dynamic_slice(t_mat, (i, 0), (1, N))
        off = i * N - (i * (i + 1)) // 2
        return jax.lax.dynamic_update_slice(buf, row, (0, N + off - (i + 1)))

    buf = jax.lax.fori_loop(0, N - 1, _pack_row,
                            jnp.zeros((1, L), jnp.float32))
    t_packed = buf[0, N:]                                  # (P,) pair targets

    # =======================================================================
    # Stage 2: max-pool over K + BCE, HBM-bound streaming over x.
    # =======================================================================
    itemsize = x.dtype.itemsize
    vmem_cap = _vmem_capacity_bytes()
    target_blk = 4 * 1024 * 1024                # ~4 MiB x blocks (roofline)

    # K blocking: cap rows-per-block so the minimal (Kb, 8, 128) tile stays
    # within the target, then balance across blocks (minimal K padding).
    kb_cap = max(1, target_blk // (8 * 128 * itemsize))
    n_k = _cdiv(K, min(K, kb_cap))
    Kb = _cdiv(K, n_k)
    n_k = _cdiv(K, Kb)

    # P blocking (rows of 128 lanes): fill the target, keep >= 2 tiles when
    # there is enough work (megacore), then balance across tiles.
    P_rows = _cdiv(P, 128)
    tr0 = max(8, (target_blk // (Kb * 128 * itemsize)) // 8 * 8)
    tr0 = min(tr0, _round_up(P_rows, 8))
    n_p = _cdiv(P_rows, tr0)
    if n_p < 2 and P_rows > 8:
        n_p = 2
    TR = _round_up(_cdiv(P_rows, n_p), 8)
    n_p = _cdiv(P_rows, TR)

    K_pad = n_k * Kb
    P_cols = n_p * TR * 128

    # Single fused pad in the native dtype (skipped when already aligned):
    # -inf K-padding rows are transparent to the max; padded P columns are
    # masked via t == -1.  The reshape below is a free bitcast.
    if K_pad != K or P_cols != P:
        x_pad = jnp.pad(x, ((0, K_pad - K), (0, P_cols - P)),
                        constant_values=float("-inf"))
    else:
        x_pad = x
    x_pad = x_pad.reshape(K_pad, n_p * TR, 128)

    t_tiles = jnp.pad(t_packed, (0, P_cols - P),
                      constant_values=-1.0).reshape(n_p * TR, 128)

    x_blk_bytes = Kb * TR * 128 * itemsize
    t_blk_bytes = TR * 128 * 4
    vmem_need = (2 * x_blk_bytes + 2 * t_blk_bytes + t_blk_bytes
                 + 2 * 8 * 128 * 4 + (2 << 20))
    vmem_limit = int(min(max(vmem_need, 32 << 20), int(vmem_cap * 0.75)))

    partials = pl.pallas_call(
        _bce_pool_kernel,
        out_shape=jax.ShapeDtypeStruct((n_p, 8, 128), jnp.float32),
        grid=(n_p, n_k),
        in_specs=[
            pl.BlockSpec((Kb, TR, 128), lambda i, k: (k, i, 0)),
            pl.BlockSpec((TR, 128), lambda i, k: (i, 0)),
        ],
        out_specs=pl.BlockSpec((1, 8, 128), lambda i, k: (i, 0, 0)),
        scratch_shapes=[pltpu.VMEM((TR, 128), jnp.float32)],
        compiler_params=pltpu.CompilerParams(
            dimension_semantics=("parallel", "arbitrary"),
            vmem_limit_bytes=vmem_limit),
    )(x_pad, t_tiles)

    return jnp.sum(partials) / jnp.float32(P)


# ---------------------------------------------------------------------------
# NumPy reference mirroring the PyTorch forward (enable_maxpool=True).
# ---------------------------------------------------------------------------
def _ref_multilabel_pair_loss(x, y):
    x = np.asarray(x, np.float64)
    y = np.asarray(y, np.float64).copy()
    y[y == -1] = 0
    n = y.shape[1]
    g = y.T @ y
    t = g[np.triu_indices(n, k=1)]
    t[t > 1] = 1
    xp = x.max(axis=0)
    bce = np.maximum(xp, 0.0) - xp * t + np.log1p(np.exp(-np.abs(xp)))
    return bce.mean()


if __name__ == "__main__":
    key = jax.random.PRNGKey(0)
    kx, ky = jax.random.split(key)
    B, N, K = 4, 16, 4                     # batch, classes, pooled dim of x
    P = N * (N - 1) // 2                   # 120 class pairs
    y = jax.random.randint(ky, (B, N), -1, 2)             # labels in {-1,0,1}
    x = jax.random.normal(kx, (K, P), dtype=jnp.float32)   # pair logits

    out = multilabel_pair_loss(x, y)
    out = jax.block_until_ready(out)

    ref = _ref_multilabel_pair_loss(np.asarray(x), np.asarray(y))
    np.testing.assert_allclose(np.asarray(out), ref, rtol=1e-4, atol=1e-6)

    print("KERNEL_OK")
</pallas_src>

<mosaic_0001>
module attributes {stable_mosaic.version = 11 : i64} {
  func.func @_pair_target_kernel(%arg0: i32, %arg1: i32, %arg2: i32, %arg3: memref<8x128xf32, #tpu.memory_space<vmem>>, %arg4: memref<8x128xf32, #tpu.memory_space<vmem>>, %arg5: memref<128x128xf32, #tpu.memory_space<vmem>>, %arg6: memref<128x128xf32, #tpu.memory_space<vmem>>) attributes {dimension_semantics = [#tpu.dimension_semantics<parallel>, #tpu.dimension_semantics<parallel>, #tpu.dimension_semantics<arbitrary>], iteration_bounds = array<i64: 1, 1, 1>, scalar_prefetch = 0 : i64, scratch_operands = 1 : i64, tpu.core_type = #tpu.core_type<tc>, window_params = [{transform_indices = @transform_0, window_bounds = array<i64: 8, 128>}, {transform_indices = @transform_1, window_bounds = array<i64: 8, 128>}, {transform_indices = @transform_2, window_bounds = array<i64: 128, 128>}]} {
    %c0_i32 = arith.constant 0 : i32
    %0 = arith.cmpi eq, %arg2, %c0_i32 : i32
    %1 = arith.extui %0 : i1 to i32
    %c0_i32_0 = arith.constant 0 : i32
    %2 = arith.cmpi ne, %1, %c0_i32_0 : i32
    scf.if %2 {
      %cst = arith.constant 0.000000e+00 : f32
      %12 = vector.broadcast %cst : f32 to vector<128x128xf32>
      %c0 = arith.constant 0 : index
      %c0_5 = arith.constant 0 : index
      %13 = vector.load %arg6[%c0, %c0_5] : memref<128x128xf32, #tpu.memory_space<vmem>>, vector<128x128xf32>
      tpu.vector_store %arg6[%c0, %c0_5], %12 {strides = array<i32>} : memref<128x128xf32, #tpu.memory_space<vmem>>, vector<128x128xf32>,
    } else {
    }
    %c128_i32 = arith.constant 128 : i32
    %3 = arith.muli %arg1, %c128_i32 : i32
    %c127_i32 = arith.constant 127 : i32
    %4 = arith.addi %3, %c127_i32 : i32
    %c128_i32_1 = arith.constant 128 : i32
    %5 = arith.muli %arg0, %c128_i32_1 : i32
    %6 = arith.cmpi sgt, %4, %5 : i32
    %7 = arith.extui %6 : i1 to i32
    %c0_i32_2 = arith.constant 0 : i32
    %8 = arith.cmpi ne, %7, %c0_i32_2 : i32
    scf.if %8 {
      %c0 = arith.constant 0 : index
      %c0_5 = arith.constant 0 : index
      %12 = vector.load %arg3[%c0, %c0_5] : memref<8x128xf32, #tpu.memory_space<vmem>>, vector<8x128xf32>
      %c0_6 = arith.constant 0 : index
      %c0_7 = arith.constant 0 : index
      %13 = vector.load %arg4[%c0_6, %c0_7] : memref<8x128xf32, #tpu.memory_space<vmem>>, vector<8x128xf32>
      %cst = arith.constant -1.000000e+00 : f32
      %14 = vector.broadcast %cst : f32 to vector<8x128xf32>
      %15 = arith.cmpf oeq, %12, %14 : vector<8x128xf32>
      %cst_8 = arith.constant 0.000000e+00 : f32
      %16 = vector.broadcast %cst_8 : f32 to vector<8x128xf32>
      %17 = arith.select %15, %16, %12 : vector<8x128xi1>, vector<8x128xf32>
      %cst_9 = arith.constant -1.000000e+00 : f32
      %18 = vector.broadcast %cst_9 : f32 to vector<8x128xf32>
      %19 = arith.cmpf oeq, %13, %18 : vector<8x128xf32>
      %cst_10 = arith.constant 0.000000e+00 : f32
      %20 = vector.broadcast %cst_10 : f32 to vector<8x128xf32>
      %21 = arith.select %19, %20, %13 : vector<8x128xi1>, vector<8x128xf32>
      %c0_11 = arith.constant 0 : index
      %c0_12 = arith.constant 0 : index
      %22 = vector.load %arg6[%c0_11, %c0_12] : memref<128x128xf32, #tpu.memory_space<vmem>>, vector<128x128xf32>
      %cst_13 = arith.constant dense<0.000000e+00> : vector<128x128xf32>
      %23 = tpu.matmul %17, %21, %cst_13 {dimension_numbers = #tpu.dot_dimension_numbers<[0], [0], [1], [1], [0, 1, 1, 1], [], []>} : vector<8x128xf32>, vector<8x128xf32>, vector<128x128xf32> -> vector<128x128xf32>
      %24 = arith.addf %22, %23 : vector<128x128xf32>
      %c0_14 = arith.constant 0 : index
      %c0_15 = arith.constant 0 : index
      %25 = vector.load %arg6[%c0_14, %c0_15] : memref<128x128xf32, #tpu.memory_space<vmem>>, vector<128x128xf32>
      tpu.vector_store %arg6[%c0_14, %c0_15], %24 {strides = array<i32>} : memref<128x128xf32, #tpu.memory_space<vmem>>, vector<128x128xf32>,
    } else {
    }
    %c0_i32_3 = arith.constant 0 : i32
    %9 = arith.cmpi eq, %arg2, %c0_i32_3 : i32
    %10 = arith.extui %9 : i1 to i32
    %c0_i32_4 = arith.constant 0 : i32
    %11 = arith.cmpi ne, %10, %c0_i32_4 : i32
    scf.if %11 {
      %c0 = arith.constant 0 : index
      %c0_5 = arith.constant 0 : index
      %12 = vector.load %arg6[%c0, %c0_5] : memref<128x128xf32, #tpu.memory_space<vmem>>, vector<128x128xf32>
      %cst = arith.constant 1.000000e+00 : f32
      %13 = vector.broadcast %cst : f32 to vector<128x128xf32>
      %14 = arith.minimumf %12, %13 : vector<128x128xf32>
      %c0_6 = arith.constant 0 : index
      %c0_7 = arith.constant 0 : index
      %15 = vector.load %arg5[%c0_6, %c0_7] : memref<128x128xf32, #tpu.memory_space<vmem>>, vector<128x128xf32>
      tpu.vector_store %arg5[%c0_6, %c0_7], %14 {strides = array<i32>} : memref<128x128xf32, #tpu.memory_space<vmem>>, vector<128x128xf32>,
    } else {
    }
    return
  }
  func.func @transform_0(%arg0: i32, %arg1: i32, %arg2: i32) -> (i32, i32) {
    %c0_i32 = arith.constant 0 : i32
    return %arg2, %arg0 : i32, i32
  }
  func.func @transform_1(%arg0: i32, %arg1: i32, %arg2: i32) -> (i32, i32) {
    %c0_i32 = arith.constant 0 : i32
    return %arg2, %arg1 : i32, i32
  }
  func.func @transform_2(%arg0: i32, %arg1: i32, %arg2: i32) -> (i32, i32) {
    %c0_i32 = arith.constant 0 : i32
    return %arg0, %arg1 : i32, i32
  }
}

module attributes {stable_mosaic.version = 11 : i64} {
  func.func @_bce_pool_kernel(%arg0: i32, %arg1: i32, %arg2: memref<4x8x128xf32, #tpu.memory_space<vmem>>, %arg3: memref<8x128xf32, #tpu.memory_space<vmem>>, %arg4: memref<1x8x128xf32, #tpu.memory_space<vmem>>, %arg5: memref<8x128xf32, #tpu.memory_space<vmem>>) attributes {dimension_semantics = [#tpu.dimension_semantics<parallel>, #tpu.dimension_semantics<arbitrary>], iteration_bounds = array<i64: 1, 1>, scalar_prefetch = 0 : i64, scratch_operands = 1 : i64, tpu.core_type = #tpu.core_type<tc>, window_params = [{transform_indices = @transform_0, window_bounds = array<i64: 4, 8, 128>}, {transform_indices = @transform_1, window_bounds = array<i64: 8, 128>}, {transform_indices = @transform_2, window_bounds = array<i64: 1, 8, 128>}]} {
    %c0 = arith.constant 0 : index
    %c0_0 = arith.constant 0 : index
    %c0_1 = arith.constant 0 : index
    %0 = vector.load %arg2[%c0, %c0_0, %c0_1] : memref<4x8x128xf32, #tpu.memory_space<vmem>>, vector<4x8x128xf32>
    %cst = arith.constant dense<0xFF800000> : vector<8x128xf32>
    %1 = vector.multi_reduction <maximumf>, %0, %cst [0] : vector<4x8x128xf32> to vector<8x128xf32>
    %c0_i32 = arith.constant 0 : i32
    %2 = arith.cmpi eq, %arg1, %c0_i32 : i32
    %3 = arith.extui %2 : i1 to i32
    %c0_i32_2 = arith.constant 0 : i32
    %4 = arith.cmpi ne, %3, %c0_i32_2 : i32
    scf.if %4 {
      %c0_7 = arith.constant 0 : index
      %c0_8 = arith.constant 0 : index
      %11 = vector.load %arg5[%c0_7, %c0_8] : memref<8x128xf32, #tpu.memory_space<vmem>>, vector<8x128xf32>
      tpu.vector_store %arg5[%c0_7, %c0_8], %1 {strides = array<i32>} : memref<8x128xf32, #tpu.memory_space<vmem>>, vector<8x128xf32>,
    } else {
    }
    %c0_i32_3 = arith.constant 0 : i32
    %5 = arith.cmpi sgt, %arg1, %c0_i32_3 : i32
    %6 = arith.extui %5 : i1 to i32
    %c0_i32_4 = arith.constant 0 : i32
    %7 = arith.cmpi ne, %6, %c0_i32_4 : i32
    scf.if %7 {
      %c0_7 = arith.constant 0 : index
      %c0_8 = arith.constant 0 : index
      %11 = vector.load %arg5[%c0_7, %c0_8] : memref<8x128xf32, #tpu.memory_space<vmem>>, vector<8x128xf32>
      %12 = arith.maximumf %11, %1 : vector<8x128xf32>
      %c0_9 = arith.constant 0 : index
      %c0_10 = arith.constant 0 : index
      %13 = vector.load %arg5[%c0_9, %c0_10] : memref<8x128xf32, #tpu.memory_space<vmem>>, vector<8x128xf32>
      tpu.vector_store %arg5[%c0_9, %c0_10], %12 {strides = array<i32>} : memref<8x128xf32, #tpu.memory_space<vmem>>, vector<8x128xf32>,
    } else {
    }
    %c0_i32_5 = arith.constant 0 : i32
    %8 = arith.cmpi eq, %arg1, %c0_i32_5 : i32
    %9 = arith.extui %8 : i1 to i32
    %c0_i32_6 = arith.constant 0 : i32
    %10 = arith.cmpi ne, %9, %c0_i32_6 : i32
    scf.if %10 {
      %c0_7 = arith.constant 0 : index
      %c0_8 = arith.constant 0 : index
      %11 = vector.load %arg5[%c0_7, %c0_8] : memref<8x128xf32, #tpu.memory_space<vmem>>, vector<8x128xf32>
      %c0_9 = arith.constant 0 : index
      %c0_10 = arith.constant 0 : index
      %12 = vector.load %arg3[%c0_9, %c0_10] : memref<8x128xf32, #tpu.memory_space<vmem>>, vector<8x128xf32>
      %cst_11 = arith.constant 0.000000e+00 : f32
      %13 = vector.broadcast %cst_11 : f32 to vector<8x128xf32>
      %14 = arith.cmpf oge, %12, %13 : vector<8x128xf32>
      %cst_12 = arith.constant 0.000000e+00 : f32
      %15 = vector.broadcast %cst_12 : f32 to vector<8x128xf32>
      %16 = arith.select %14, %12, %15 : vector<8x128xi1>, vector<8x128xf32>
      %cst_13 = arith.constant 0.000000e+00 : f32
      %17 = vector.broadcast %cst_13 : f32 to vector<8x128xf32>
      %18 = arith.maximumf %11, %17 : vector<8x128xf32>
      %19 = arith.mulf %11, %16 : vector<8x128xf32>
      %20 = arith.subf %18, %19 : vector<8x128xf32>
      %21 = math.absf %11 : vector<8x128xf32>
      %cst_14 = arith.constant 0.000000e+00 : f32
      %22 = vector.broadcast %cst_14 : f32 to vector<8x128xf32>
      %23 = arith.subf %22, %21 : vector<8x128xf32>
      %24 = math.exp %23 : vector<8x128xf32>
      %cst_15 = arith.constant 1.000000e+00 : f32
      %25 = vector.broadcast %cst_15 : f32 to vector<8x128xf32>
      %26 = arith.addf %25, %24 : vector<8x128xf32>
      %27 = math.log %26 : vector<8x128xf32>
      %28 = arith.addf %20, %27 : vector<8x128xf32>
      %cst_16 = arith.constant 0.000000e+00 : f32
      %29 = vector.broadcast %cst_16 : f32 to vector<8x128xf32>
      %30 = arith.select %14, %28, %29 : vector<8x128xi1>, vector<8x128xf32>
      %31 = vector.shape_cast %30 : vector<8x128xf32> to vector<1x8x128xf32>
      %cst_17 = arith.constant dense<0.000000e+00> : vector<8x128xf32>
      %32 = vector.multi_reduction <add>, %31, %cst_17 [0] : vector<1x8x128xf32> to vector<8x128xf32>
      %33 = vector.shape_cast %32 : vector<8x128xf32> to vector<1x8x128xf32>
      %c0_18 = arith.constant 0 : index
      %c0_19 = arith.constant 0 : index
      %c0_20 = arith.constant 0 : index
      %34 = vector.load %arg4[%c0_18, %c0_19, %c0_20] : memref<1x8x128xf32, #tpu.memory_space<vmem>>, vector<1x8x128xf32>
      tpu.vector_store %arg4[%c0_18, %c0_19, %c0_20], %33 {strides = array<i32>} : memref<1x8x128xf32, #tpu.memory_space<vmem>>, vector<1x8x128xf32>,
    } else {
    }
    return
  }
  func.func @transform_0(%arg0: i32, %arg1: i32) -> (i32, i32, i32) {
    %c0_i32 = arith.constant 0 : i32
    %c0_i32_0 = arith.constant 0 : i32
    return %arg1, %arg0, %c0_i32 : i32, i32, i32
  }
  func.func @transform_1(%arg0: i32, %arg1: i32) -> (i32, i32) {
    %c0_i32 = arith.constant 0 : i32
    %c0_i32_0 = arith.constant 0 : i32
    return %arg0, %c0_i32 : i32, i32
  }
  func.func @transform_2(%arg0: i32, %arg1: i32) -> (i32, i32, i32) {
    %c0_i32 = arith.constant 0 : i32
    %c0_i32_0 = arith.constant 0 : i32
    %c0_i32_1 = arith.constant 0 : i32
    return %arg0, %c0_i32, %c0_i32_0 : i32, i32, i32
  }
}

</mosaic_0001>

<bundles_post_ra>
// kernel: multilabel_pair_loss.3
= control target key start
LH: loop header
LB: loop body
LE: loop exit
PB: predicated region body
PF: predicated region fallthrough
CT: control target
= control target key end

     0   :  { %s92_s0 = inlined_call_operand.vmem [shape: f32[4,8,128], index: 0, kind: input, shape index: {}]   ;;  %s93_s1 = inlined_call_operand.vmem [shape: f32[8,128], index: 1, kind: input, shape index: {}]   ;;  %s94_s2 = inlined_call_operand.vmem [shape: f32[1,8,128], index: 2, kind: output, shape index: {}]  }
   0x1   :  { %v11_v0 = vld [vmem:[%s92_s0] sm:$0xff]  ;;  %v12_v1 = vld [vmem:[%s92_s0 + $0x8] sm:$0xff]  ;;  %v13_v2 = vld [vmem:[%s92_s0 + $0x10] sm:$0xff] }
   0x2   :  { %v14_v3 = vld [vmem:[%s92_s0 + $0x18] sm:$0xff]  ;;  %v15_v4 = vmax.f32 %v11_v0, %v12_v1  ;;  %v34_v10 = vld [vmem:[%s93_s1] sm:$0xff] }
   0x3   :  { %v16_v5 = vmax.f32 %v13_v2, %v14_v3  ;;  %vm35_vm0 = vcmp.ge.f32.partialorder %v34_v10, 0.0 }
   0x4   :  { %v36_v12 = vsel %vm35_vm0, %v34_v10, 0.0 }
   0x5   :  { %v17_v6 = vmax.f32 %v15_v4, %v16_v5 }
   0x7   :  { %v40_v7 = vand.u32 2147483647, %v17_v6  ;;  %v37_v14 = vmax.f32 %v17_v6, 0.0  ;;  %v38_v15 = vmul.f32 %v36_v12, %v17_v6 }
   0x9   :  { %v41_v8 = vsub.f32 0.0, %v40_v7  ;;  %v39_v16 = vsub.f32 %v37_v14, %v38_v15 }
   0xb   :  { %v42_v9 = vmul.f32 1.442695, %v41_v8 }
   0xd   :  { %55 = vpow2.f32 %v42_v9 }
  0x13   :  { %v56_v11 = vpop.eup %55 }
  0x14   :  { %v44_v13 = vadd.f32 1.0, %v56_v11 }
  0x16   :  { %57 = vlog2.f32 %v44_v13 }
  0x1c   :  { %v58_v17 = vpop.eup %57 }
  0x1d   :  { %v46_v18 = vmul.f32 0.6931472, %v58_v17 }
  0x1f   :  { %v47_v19 = vadd.f32 %v46_v18, %v39_v16 }
  0x21   :  { %v48_v20 = vsel %vm35_vm0, %v47_v19, 0.0 }
  0x22   :  { %50 = vst [vmem:[%s94_s2] sm:$0xff] %v48_v20 }

// kernel: multilabel_pair_loss.2
= control target key start
LH: loop header
LB: loop body
LE: loop exit
PB: predicated region body
PF: predicated region fallthrough
CT: control target
= control target key end

     0   :  { %vm92_vm3 = vcmask 64512   ;;  %s400_s0 = inlined_call_operand.vmem [shape: f32[8,128], index: 0, kind: input, shape index: {}, may-alias: {0,1}]   ;;  %s401_s1 = inlined_call_operand.vmem [shape: f32[8,128], index: 1, kind: input, shape index: {}, may-alias: {0,1}]   ;;  %s402_s2 = inlined_call_operand.vmem [shape: f32[128,128], index: 2, kind: output, shape index: {}]  }
   0x1   :  { %v38_v0 = vld [vmem:[%s400_s0] sm:$0xff] }
   0x2   :  { %v39_v1 = vld [vmem:[%s401_s1] sm:$0xff]  ;;  %vm40_vm0 = vcmp.eq.f32.partialorder %v38_v0, -1.0 }
   0x3   :  { %vm42_vm1 = vcmp.eq.f32.partialorder %v39_v1, -1.0  ;;  %v41_v2 = vsel %vm40_vm0, 0.0, %v38_v0 }
   0x4   :  { %vm293_vm2 = vmneg %vm42_vm1  ;;  %60 = vxpose.xlu0.b32.start.end [1/1] (short) %v41_v2, 128 }
   0x5   :  { %294 = vmatpush.msk.msra.mxu0 %vm293_vm2, %v39_v1  ;;  %311 = vmatpush.msk.msra.mxu1 %vm293_vm2, %v39_v1 }
   0x6   :  { %312 = vmatpush.msk.msra.mxu2 %vm293_vm2, %v39_v1  ;;  %313 = vmatpush.msk.msra.mxu3 %vm293_vm2, %v39_v1 }
  0xa8   :  { %v76_v3 = vpop.trf.xlu0 }
  0xa9   :  { %295 = vmatmul.msk.f32.vlgmr.msra.gmra.mxu0 %vm92_vm3, %v76_v3 }
  0xb0   :  { %v77_v4 = vpop.trf.xlu0 }
  0xb1   :  { %296 = vmatmul.msk.f32.gmra.mxu0 %vm92_vm3, %v77_v4 }
  0xb8   :  { %v78_v5 = vpop.trf.xlu0 }
  0xb9   :  { %297 = vmatmul.msk.f32.gmra.mxu0 %vm92_vm3, %v78_v5 }
  0xc0   :  { %v79_v6 = vpop.trf.xlu0 }
  0xc1   :  { %298 = vmatmul.msk.f32.gmra.mxu0 %vm92_vm3, %v79_v6 }
  0xc8   :  { %v80_v7 = vpop.trf.xlu0 }
  0xc9   :  { %299 = vmatmul.msk.f32.vlgmr.msra.gmra.mxu1 %vm92_vm3, %v80_v7 }
  0xd0   :  { %v81_v8 = vpop.trf.xlu0 }
  0xd1   :  { %300 = vmatmul.msk.f32.gmra.mxu1 %vm92_vm3, %v81_v8 }
  0xd8   :  { %v82_v9 = vpop.trf.xlu0 }
  0xd9   :  { %301 = vmatmul.msk.f32.gmra.mxu1 %vm92_vm3, %v82_v9 }
  0xe0   :  { %v83_v10 = vpop.trf.xlu0 }
  0xe1   :  { %302 = vmatmul.msk.f32.gmra.mxu1 %vm92_vm3, %v83_v10 }
  0xe8   :  { %v84_v11 = vpop.trf.xlu0 }
  0xe9   :  { %303 = vmatmul.msk.f32.vlgmr.msra.gmra.mxu2 %vm92_vm3, %v84_v11 }
  0xf0   :  { %v85_v12 = vpop.trf.xlu0 }
  0xf1   :  { %304 = vmatmul.msk.f32.gmra.mxu2 %vm92_vm3, %v85_v12 }
  0xf8   :  { %v86_v13 = vpop.trf.xlu0 }
  0xf9   :  { %305 = vmatmul.msk.f32.gmra.mxu2 %vm92_vm3, %v86_v13 }
 0x100   :  { %v87_v14 = vpop.trf.xlu0 }
 0x101   :  { %306 = vmatmul.msk.f32.gmra.mxu2 %vm92_vm3, %v87_v14 }
 0x108   :  { %v88_v15 = vpop.trf.xlu0 }
 0x109   :  { %307 = vmatmul.msk.f32.vlgmr.msra.gmra.mxu3 %vm92_vm3, %v88_v15 }
 0x110   :  { %v89_v16 = vpop.trf.xlu0 }
 0x111   :  { %308 = vmatmul.msk.f32.gmra.mxu3 %vm92_vm3, %v89_v16 }
 0x118   :  { %v90_v17 = vpop.trf.xlu0 }
 0x119   :  { %309 = vmatmul.msk.f32.gmra.mxu3 %vm92_vm3, %v90_v17 }
 0x120   :  { %v91_v18 = vpop.trf.xlu0 }
 0x121   :  { %310 = vmatmul.msk.f32.gmra.mxu3 %vm92_vm3, %v91_v18 }
 0x126   :  { %v158_v19 = vpop.f32.mrf.mxu0 }
 0x127   :  { %v257_v20 = vmin.f32 %v158_v19, 1.0 }
 0x129   :  { %273 = vst [vmem:[%s402_s2] sm:$0xff] %v257_v20 }
 0x12e   :  { %v161_v21 = vpop.f32.mrf.mxu0 }
 0x12f   :  { %v258_v22 = vmin.f32 %v161_v21, 1.0 }
 0x131   :  { %274 = vst [vmem:[%s402_s2 + $0x8] sm:$0xff] %v258_v22 }
 0x136   :  { %v164_v23 = vpop.f32.mrf.mxu0 }
 0x137   :  { %v259_v24 = vmin.f32 %v164_v23, 1.0 }
 0x139   :  { %275 = vst [vmem:[%s402_s2 + $0x10] sm:$0xff] %v259_v24 }
 0x13e   :  { %v167_v25 = vpop.f32.mrf.mxu0 }
 0x13f   :  { %v260_v26 = vmin.f32 %v167_v25, 1.0 }
 0x141   :  { %276 = vst [vmem:[%s402_s2 + $0x18] sm:$0xff] %v260_v26 }
 0x146   :  { %v170_v27 = vpop.f32.mrf.mxu1 }
 0x147   :  { %v261_v28 = vmin.f32 %v170_v27, 1.0 }
 0x149   :  { %277 = vst [vmem:[%s402_s2 + $0x20] sm:$0xff] %v261_v28 }
 0x14e   :  { %v173_v29 = vpop.f32.mrf.mxu1 }
 0x14f   :  { %v262_v30 = vmin.f32 %v173_v29, 1.0 }
 0x151   :  { %278 = vst [vmem:[%s402_s2 + $0x28] sm:$0xff] %v262_v30 }
 0x156   :  { %v176_v31 = vpop.f32.mrf.mxu1 }
 0x157   :  { %v263_v32 = vmin.f32 %v176_v31, 1.0 }
 0x159   :  { %279 = vst [vmem:[%s402_s2 + $0x30] sm:$0xff] %v263_v32 }
 0x15e   :  { %v179_v33 = vpop.f32.mrf.mxu1 }
 0x15f   :  { %v264_v34 = vmin.f32 %v179_v33, 1.0 }
 0x161   :  { %280 = vst [vmem:[%s402_s2 + $0x38] sm:$0xff] %v264_v34 }
 0x16c   :  { %v182_v35 = vpop.f32.mrf.mxu2 }
 0x16d   :  { %v265_v36 = vmin.f32 %v182_v35, 1.0 }
 0x16f   :  { %281 = vst [vmem:[%s402_s2 + $0x40] sm:$0xff] %v265_v36 }
 0x174   :  { %v185_v37 = vpop.f32.mrf.mxu2 }
 0x175   :  { %v266_v38 = vmin.f32 %v185_v37, 1.0 }
 0x177   :  { %282 = vst [vmem:[%s402_s2 + $0x48] sm:$0xff] %v266_v38 }
 0x17c   :  { %v188_v39 = vpop.f32.mrf.mxu2 }
 0x17d   :  { %v267_v40 = vmin.f32 %v188_v39, 1.0 }
 0x17f   :  { %283 = vst [vmem:[%s402_s2 + $0x50] sm:$0xff] %v267_v40 }
 0x184   :  { %v191_v41 = vpop.f32.mrf.mxu2 }
 0x185   :  { %v268_v42 = vmin.f32 %v191_v41, 1.0 }
 0x187   :  { %284 = vst [vmem:[%s402_s2 + $0x58] sm:$0xff] %v268_v42 }
 0x18c   :  { %v194_v43 = vpop.f32.mrf.mxu3 }
 0x18d   :  { %v269_v44 = vmin.f32 %v194_v43, 1.0 }
 0x18f   :  { %285 = vst [vmem:[%s402_s2 + $0x60] sm:$0xff] %v269_v44 }
 0x194   :  { %v197_v45 = vpop.f32.mrf.mxu3 }
 0x195   :  { %v270_v46 = vmin.f32 %v197_v45, 1.0 }
 0x197   :  { %286 = vst [vmem:[%s402_s2 + $0x68] sm:$0xff] %v270_v46 }
 0x19c   :  { %v200_v47 = vpop.f32.mrf.mxu3 }
 0x19d   :  { %v271_v48 = vmin.f32 %v200_v47, 1.0 }
 0x19f   :  { %287 = vst [vmem:[%s402_s2 + $0x70] sm:$0xff] %v271_v48 }
 0x1a4   :  { %v203_v49 = vpop.f32.mrf.mxu3 }
 0x1a5   :  { %v272_v50 = vmin.f32 %v203_v49, 1.0 }
 0x1a7   :  { %288 = vst [vmem:[%s402_s2 + $0x78] sm:$0xff] %v272_v50 }

</bundles_post_ra>
